<compile_context>
chip_gen: v6e
topology: v6e:2x2x1
jax: 0.10.0
libtpu: 0.0.40
codegen_flags: <defaults>
</compile_context>

<pallas_src>
import functools

import jax
import jax.numpy as jnp
from jax.experimental import pallas as pl
from jax.experimental.pallas import tpu as pltpu


def _round_up(x, m):
    return ((x + m - 1) // m) * m


def roberta_output_kernel(x_ref, w_ref, b_ref, res_ref, g_ref, beta_ref,
                          o_ref, *, eps):
    # x_ref:   (TM, K)  token tile of intermediate activations
    # w_ref:   (K,  N)  dense weight in (in, out) layout (possibly bf16)
    # b_ref:   (1,  N)  dense bias
    # res_ref: (TM, N)  residual (input_tensor) tile
    # g_ref:   (1,  N)  LayerNorm gamma
    # beta_ref:(1,  N)  LayerNorm beta
    # o_ref:   (TM, N)  output tile

    x = x_ref[...]
    w = w_ref[...]
    # MXU matmul: operands in the dtype they were shipped in (bf16 weight ->
    # bf16 MXU passes); x tile is cast to match (cheap, hidden under matmul).
    # Accumulation is always f32.
    y = jnp.dot(x.astype(w.dtype), w, preferred_element_type=jnp.float32)
    y = y + b_ref[...].astype(jnp.float32)

    # TODO(synk): dropout is identity here (eval mode); training-mode dropout
    # would need pltpu.prng_seed / pltpu.prng_random_bits masking + 1/(1-p).

    # Residual add + LayerNorm over the hidden (lane) axis, all in f32.
    y = y + res_ref[...].astype(jnp.float32)
    n = y.shape[-1]
    mean = jnp.sum(y, axis=-1, keepdims=True) * (1.0 / n)
    centered = y - mean
    var = jnp.sum(centered * centered, axis=-1, keepdims=True) * (1.0 / n)
    normed = centered * jax.lax.rsqrt(var + eps)
    out = (normed * g_ref[...].astype(jnp.float32)
           + beta_ref[...].astype(jnp.float32))

    o_ref[...] = out.astype(o_ref.dtype)


def _build_call(m_pad, k, n, tm, out_dtype, eps, vmem_limit_bytes,
                single_buffer_invariants):
    if single_buffer_invariants:
        # Grid-invariant operands (constant index_map): DMA'd once; Buffered(1)
        # avoids allocating a second copy of the multi-MiB weight in VMEM.
        def inv(shape):
            return pl.BlockSpec(shape, lambda i: (0, 0),
                                pipeline_mode=pl.Buffered(1))
    else:
        def inv(shape):
            return pl.BlockSpec(shape, lambda i: (0, 0))

    return pl.pallas_call(
        functools.partial(roberta_output_kernel, eps=eps),
        out_shape=jax.ShapeDtypeStruct((m_pad, n), out_dtype),
        grid_spec=pltpu.PrefetchScalarGridSpec(
            num_scalar_prefetch=0,
            grid=(m_pad // tm,),
            in_specs=[
                pl.BlockSpec((tm, k), lambda i: (i, 0)),   # x token tile
                inv((k, n)),                               # weight (resident)
                inv((1, n)),                               # bias
                pl.BlockSpec((tm, n), lambda i: (i, 0)),   # residual tile
                inv((1, n)),                               # gamma
                inv((1, n)),                               # beta
            ],
            out_specs=pl.BlockSpec((tm, n), lambda i: (i, 0)),
        ),
        compiler_params=pltpu.CompilerParams(
            dimension_semantics=("parallel",),
            vmem_limit_bytes=vmem_limit_bytes,
        ),
    )


def roberta_output(hidden_states, input_tensor, w_kn, b, gamma, beta,
                   *, eps=1e-5, tm=256, compute_dtype=None):
    """Fused RobertaOutput forward (eval mode).

    hidden_states: (B, S, K) intermediate activations
    input_tensor:  (B, S, N) residual
    w_kn:          (K, N) dense weight ALREADY in (in, out) layout; transpose
                   the torch-style (N, K) weight once at load time, not per call.
    compute_dtype: optional MXU operand dtype (e.g. jnp.bfloat16); accumulation
                   and LayerNorm stay in f32.
    """
    B, S, K = hidden_states.shape
    N = input_tensor.shape[-1]
    M = B * S

    # Ship MXU operands in compute_dtype (ideally the weight is stored that way).
    if compute_dtype is not None and w_kn.dtype != jnp.dtype(compute_dtype):
        w_kn = w_kn.astype(compute_dtype)

    x2d = hidden_states.reshape(M, K)
    r2d = input_tensor.reshape(M, N)
    b2d = b.reshape(1, N)
    g2d = gamma.reshape(1, N)
    beta2d = beta.reshape(1, N)

    # Token tile: large (MXU-friendly), multiple of the dtype sublane pack,
    # but not larger than needed for small problems. Pad M to a tile multiple
    # (padded rows are benign and sliced off afterwards).
    pack = 8 if jnp.dtype(hidden_states.dtype).itemsize >= 4 else 16
    tm_eff = max(pack, min(tm, _round_up(M, pack)))
    tm_eff = (tm_eff // pack) * pack
    num_tiles = pl.cdiv(M, tm_eff)
    M_pad = num_tiles * tm_eff
    if M_pad != M:
        x2d = jnp.pad(x2d, ((0, M_pad - M), (0, 0)))
        r2d = jnp.pad(r2d, ((0, M_pad - M), (0, 0)))

    out_dtype = hidden_states.dtype

    # Explicit VMEM budget: weight (worst case double-buffered) + double-
    # buffered activation/output tiles + small vectors, with 1.5x headroom,
    # clamped to what every TPU generation (incl. v7x's 64 MiB) can hold.
    def isz(a):
        return jnp.dtype(a.dtype).itemsize
    need = (K * N * isz(w_kn) * 2
            + tm_eff * K * isz(x2d) * 2
            + tm_eff * N * isz(r2d) * 2
            + tm_eff * N * jnp.dtype(out_dtype).itemsize * 2
            + 3 * N * 4 * 2)
    vmem_limit = int(min(max(need * 3 // 2, 32 << 20), 64 << 20))

    args = (x2d, w_kn, b2d, r2d, g2d, beta2d)
    try:
        out2d = _build_call(M_pad, K, N, tm_eff, out_dtype, eps, vmem_limit,
                            single_buffer_invariants=True)(*args)
    except Exception:
        # pipeline_mode=pl.Buffered(1) not supported by this JAX build; the
        # constant index_map still means the weight is DMA'd only once (just
        # with a default double buffer).
        out2d = _build_call(M_pad, K, N, tm_eff, out_dtype, eps, vmem_limit,
                            single_buffer_invariants=False)(*args)

    return out2d[:M].reshape(B, S, N)


def roberta_output_ref(hidden_states, input_tensor, w, b, gamma, beta, eps=1e-5):
    # w is torch-style (N, K)
    y = jnp.einsum("bsk,nk->bsn", hidden_states, w) + b
    y = y + input_tensor
    mean = jnp.mean(y, axis=-1, keepdims=True)
    var = jnp.mean((y - mean) ** 2, axis=-1, keepdims=True)
    return (y - mean) * jax.lax.rsqrt(var + eps) * gamma + beta


if __name__ == "__main__":
    # Small config: batch=2, seq=8, intermediate_size=128, hidden_size=32
    B, S, K, N = 2, 8, 128, 32
    eps = 1e-5

    key = jax.random.PRNGKey(0)
    k1, k2, k3, k4 = jax.random.split(key, 4)

    hidden_states = jax.random.normal(k1, (B, S, K), dtype=jnp.float32)
    input_tensor = jax.random.normal(k2, (B, S, N), dtype=jnp.float32)

    # nn.Linear-like params (torch layout (out, in)), LayerNorm gamma=1, beta=0
    w = jax.random.normal(k3, (N, K), dtype=jnp.float32) * (1.0 / (K ** 0.5))
    bvec = jax.random.normal(k4, (N,), dtype=jnp.float32) * 0.02
    gamma = jnp.ones((N,), dtype=jnp.float32)
    beta = jnp.zeros((N,), dtype=jnp.float32)

    # Pre-transpose ONCE (parameter-load time), not per call.
    w_kn = jnp.asarray(w.T)  # (K, N)

    ref = roberta_output_ref(hidden_states, input_tensor, w, bvec, gamma, beta,
                             eps=eps)

    # 1) f32 path — tight tolerance.
    out = roberta_output(hidden_states, input_tensor, w_kn, bvec, gamma, beta,
                         eps=eps)
    out = jax.block_until_ready(out)
    assert out.shape == (B, S, N)
    assert jnp.allclose(out, ref, atol=1e-4, rtol=1e-4), "f32 mismatch vs ref"

    # 2) bf16 MXU operands (f32 accumulation + f32 LayerNorm) — looser tolerance.
    out_bf16 = roberta_output(hidden_states, input_tensor,
                              w_kn.astype(jnp.bfloat16), bvec, gamma, beta,
                              eps=eps, compute_dtype=jnp.bfloat16)
    out_bf16 = jax.block_until_ready(out_bf16)
    assert jnp.allclose(out_bf16, ref, atol=5e-2, rtol=5e-2), "bf16 mismatch"

    # 3) token count not divisible by the tile — exercises the padding path.
    hs_odd, res_odd = hidden_states[:, :7], input_tensor[:, :7]
    out_odd = roberta_output(hs_odd, res_odd, w_kn, bvec, gamma, beta, eps=eps)
    out_odd = jax.block_until_ready(out_odd)
    ref_odd = roberta_output_ref(hs_odd, res_odd, w, bvec, gamma, beta, eps=eps)
    assert jnp.allclose(out_odd, ref_odd, atol=1e-4, rtol=1e-4), "pad mismatch"

    print("KERNEL_OK")
</pallas_src>

<mosaic_0001>
module attributes {stable_mosaic.version = 11 : i64} {
  func.func @roberta_output_kernel(%arg0: i32, %arg1: memref<16x128xf32, #tpu.memory_space<vmem>>, %arg2: memref<128x32xf32, #tpu.memory_space<vmem>>, %arg3: memref<1x32xf32, #tpu.memory_space<vmem>>, %arg4: memref<16x32xf32, #tpu.memory_space<vmem>>, %arg5: memref<1x32xf32, #tpu.memory_space<vmem>>, %arg6: memref<1x32xf32, #tpu.memory_space<vmem>>, %arg7: memref<16x32xf32, #tpu.memory_space<vmem>>) attributes {dimension_semantics = [#tpu.dimension_semantics<parallel>], iteration_bounds = array<i64: 1>, scalar_prefetch = 0 : i64, scratch_operands = 0 : i64, tpu.core_type = #tpu.core_type<tc>, window_params = [{transform_indices = @transform_0, window_bounds = array<i64: 16, 128>}, {pipeline_mode = #tpu.pipeline_mode<synchronous>, transform_indices = @transform_1, window_bounds = array<i64: 128, 32>}, {pipeline_mode = #tpu.pipeline_mode<synchronous>, transform_indices = @transform_2, window_bounds = array<i64: 1, 32>}, {transform_indices = @transform_3, window_bounds = array<i64: 16, 32>}, {pipeline_mode = #tpu.pipeline_mode<synchronous>, transform_indices = @transform_4, window_bounds = array<i64: 1, 32>}, {pipeline_mode = #tpu.pipeline_mode<synchronous>, transform_indices = @transform_5, window_bounds = array<i64: 1, 32>}, {transform_indices = @transform_6, window_bounds = array<i64: 16, 32>}]} {
    %c0 = arith.constant 0 : index
    %c0_0 = arith.constant 0 : index
    %0 = vector.load %arg1[%c0, %c0_0] : memref<16x128xf32, #tpu.memory_space<vmem>>, vector<16x128xf32>
    %c0_1 = arith.constant 0 : index
    %c0_2 = arith.constant 0 : index
    %1 = vector.load %arg2[%c0_1, %c0_2] : memref<128x32xf32, #tpu.memory_space<vmem>>, vector<128x32xf32>
    %cst = arith.constant dense<0.000000e+00> : vector<16x32xf32>
    %2 = tpu.matmul %0, %1, %cst {dimension_numbers = #tpu.dot_dimension_numbers<[1], [0], [0], [1], [0, 0, 1, 1], [], []>} : vector<16x128xf32>, vector<128x32xf32>, vector<16x32xf32> -> vector<16x32xf32>
    %c0_3 = arith.constant 0 : index
    %c0_4 = arith.constant 0 : index
    %3 = vector.load %arg3[%c0_3, %c0_4] : memref<1x32xf32, #tpu.memory_space<vmem>>, vector<1x32xf32>
    %4 = vector.broadcast %3 : vector<1x32xf32> to vector<16x32xf32>
    %5 = arith.addf %2, %4 : vector<16x32xf32>
    %c0_5 = arith.constant 0 : index
    %c0_6 = arith.constant 0 : index
    %6 = vector.load %arg4[%c0_5, %c0_6] : memref<16x32xf32, #tpu.memory_space<vmem>>, vector<16x32xf32>
    %7 = arith.addf %5, %6 : vector<16x32xf32>
    %cst_7 = arith.constant dense<0.000000e+00> : vector<16xf32>
    %8 = vector.multi_reduction <add>, %7, %cst_7 [1] : vector<16x32xf32> to vector<16xf32>
    %9 = vector.shape_cast %8 : vector<16xf32> to vector<16x1xf32>
    %cst_8 = arith.constant 3.125000e-02 : f32
    %10 = vector.broadcast %cst_8 : f32 to vector<16x1xf32>
    %11 = arith.mulf %9, %10 : vector<16x1xf32>
    %12 = vector.broadcast %11 : vector<16x1xf32> to vector<16x32xf32>
    %13 = arith.subf %7, %12 : vector<16x32xf32>
    %14 = arith.mulf %13, %13 : vector<16x32xf32>
    %cst_9 = arith.constant dense<0.000000e+00> : vector<16xf32>
    %15 = vector.multi_reduction <add>, %14, %cst_9 [1] : vector<16x32xf32> to vector<16xf32>
    %16 = vector.shape_cast %15 : vector<16xf32> to vector<16x1xf32>
    %cst_10 = arith.constant 3.125000e-02 : f32
    %17 = vector.broadcast %cst_10 : f32 to vector<16x1xf32>
    %18 = arith.mulf %16, %17 : vector<16x1xf32>
    %cst_11 = arith.constant 9.99999974E-6 : f32
    %19 = vector.broadcast %cst_11 : f32 to vector<16x1xf32>
    %20 = arith.addf %18, %19 : vector<16x1xf32>
    %21 = math.rsqrt %20 : vector<16x1xf32>
    %22 = vector.broadcast %21 : vector<16x1xf32> to vector<16x32xf32>
    %23 = arith.mulf %13, %22 : vector<16x32xf32>
    %c0_12 = arith.constant 0 : index
    %c0_13 = arith.constant 0 : index
    %24 = vector.load %arg5[%c0_12, %c0_13] : memref<1x32xf32, #tpu.memory_space<vmem>>, vector<1x32xf32>
    %25 = vector.broadcast %24 : vector<1x32xf32> to vector<16x32xf32>
    %26 = arith.mulf %23, %25 : vector<16x32xf32>
    %c0_14 = arith.constant 0 : index
    %c0_15 = arith.constant 0 : index
    %27 = vector.load %arg6[%c0_14, %c0_15] : memref<1x32xf32, #tpu.memory_space<vmem>>, vector<1x32xf32>
    %28 = vector.broadcast %27 : vector<1x32xf32> to vector<16x32xf32>
    %29 = arith.addf %26, %28 : vector<16x32xf32>
    %c0_16 = arith.constant 0 : index
    %c0_17 = arith.constant 0 : index
    %30 = vector.load %arg7[%c0_16, %c0_17] : memref<16x32xf32, #tpu.memory_space<vmem>>, vector<16x32xf32>
    tpu.vector_store %arg7[%c0_16, %c0_17], %29 {strides = array<i32>} : memref<16x32xf32, #tpu.memory_space<vmem>>, vector<16x32xf32>,
    return
  }
  func.func @transform_0(%arg0: i32) -> (i32, i32) {
    %c0_i32 = arith.constant 0 : i32
    %c0_i32_0 = arith.constant 0 : i32
    return %arg0, %c0_i32 : i32, i32
  }
  func.func @transform_1(%arg0: i32) -> (i32, i32) {
    %c0_i32 = arith.constant 0 : i32
    %c0_i32_0 = arith.constant 0 : i32
    %c0_i32_1 = arith.constant 0 : i32
    return %c0_i32, %c0_i32_0 : i32, i32
  }
  func.func @transform_2(%arg0: i32) -> (i32, i32) {
    %c0_i32 = arith.constant 0 : i32
    %c0_i32_0 = arith.constant 0 : i32
    %c0_i32_1 = arith.constant 0 : i32
    return %c0_i32, %c0_i32_0 : i32, i32
  }
  func.func @transform_3(%arg0: i32) -> (i32, i32) {
    %c0_i32 = arith.constant 0 : i32
    %c0_i32_0 = arith.constant 0 : i32
    return %arg0, %c0_i32 : i32, i32
  }
  func.func @transform_4(%arg0: i32) -> (i32, i32) {
    %c0_i32 = arith.constant 0 : i32
    %c0_i32_0 = arith.constant 0 : i32
    %c0_i32_1 = arith.constant 0 : i32
    return %c0_i32, %c0_i32_0 : i32, i32
  }
  func.func @transform_5(%arg0: i32) -> (i32, i32) {
    %c0_i32 = arith.constant 0 : i32
    %c0_i32_0 = arith.constant 0 : i32
    %c0_i32_1 = arith.constant 0 : i32
    return %c0_i32, %c0_i32_0 : i32, i32
  }
  func.func @transform_6(%arg0: i32) -> (i32, i32) {
    %c0_i32 = arith.constant 0 : i32
    %c0_i32_0 = arith.constant 0 : i32
    return %arg0, %c0_i32 : i32, i32
  }
}

module attributes {stable_mosaic.version = 11 : i64} {
  func.func @roberta_output_kernel(%arg0: i32, %arg1: memref<16x128xf32, #tpu.memory_space<vmem>>, %arg2: memref<128x32xf32, #tpu.memory_space<vmem>>, %arg3: memref<1x32xf32, #tpu.memory_space<vmem>>, %arg4: memref<16x32xf32, #tpu.memory_space<vmem>>, %arg5: memref<1x32xf32, #tpu.memory_space<vmem>>, %arg6: memref<1x32xf32, #tpu.memory_space<vmem>>, %arg7: memref<16x32xf32, #tpu.memory_space<vmem>>) attributes {dimension_semantics = [#tpu.dimension_semantics<parallel>], iteration_bounds = array<i64: 1>, scalar_prefetch = 0 : i64, scratch_operands = 0 : i64, tpu.core_type = #tpu.core_type<tc>, window_params = [{transform_indices = @transform_0, window_bounds = array<i64: 16, 128>}, {pipeline_mode = #tpu.pipeline_mode<synchronous>, transform_indices = @transform_1, window_bounds = array<i64: 128, 32>}, {pipeline_mode = #tpu.pipeline_mode<synchronous>, transform_indices = @transform_2, window_bounds = array<i64: 1, 32>}, {transform_indices = @transform_3, window_bounds = array<i64: 16, 32>}, {pipeline_mode = #tpu.pipeline_mode<synchronous>, transform_indices = @transform_4, window_bounds = array<i64: 1, 32>}, {pipeline_mode = #tpu.pipeline_mode<synchronous>, transform_indices = @transform_5, window_bounds = array<i64: 1, 32>}, {transform_indices = @transform_6, window_bounds = array<i64: 16, 32>}]} {
    %c0 = arith.constant 0 : index
    %c0_0 = arith.constant 0 : index
    %0 = vector.load %arg1[%c0, %c0_0] : memref<16x128xf32, #tpu.memory_space<vmem>>, vector<16x128xf32>
    %c0_1 = arith.constant 0 : index
    %c0_2 = arith.constant 0 : index
    %1 = vector.load %arg2[%c0_1, %c0_2] : memref<128x32xf32, #tpu.memory_space<vmem>>, vector<128x32xf32>
    %cst = arith.constant dense<0.000000e+00> : vector<16x32xf32>
    %2 = tpu.matmul %0, %1, %cst {dimension_numbers = #tpu.dot_dimension_numbers<[1], [0], [0], [1], [0, 0, 1, 1], [], []>} : vector<16x128xf32>, vector<128x32xf32>, vector<16x32xf32> -> vector<16x32xf32>
    %c0_3 = arith.constant 0 : index
    %c0_4 = arith.constant 0 : index
    %3 = vector.load %arg3[%c0_3, %c0_4] : memref<1x32xf32, #tpu.memory_space<vmem>>, vector<1x32xf32>
    %4 = vector.broadcast %3 : vector<1x32xf32> to vector<16x32xf32>
    %5 = arith.addf %2, %4 : vector<16x32xf32>
    %c0_5 = arith.constant 0 : index
    %c0_6 = arith.constant 0 : index
    %6 = vector.load %arg4[%c0_5, %c0_6] : memref<16x32xf32, #tpu.memory_space<vmem>>, vector<16x32xf32>
    %7 = arith.addf %5, %6 : vector<16x32xf32>
    %cst_7 = arith.constant dense<0.000000e+00> : vector<16xf32>
    %8 = vector.multi_reduction <add>, %7, %cst_7 [1] : vector<16x32xf32> to vector<16xf32>
    %9 = vector.shape_cast %8 : vector<16xf32> to vector<16x1xf32>
    %cst_8 = arith.constant 3.125000e-02 : f32
    %10 = vector.broadcast %cst_8 : f32 to vector<16x1xf32>
    %11 = arith.mulf %9, %10 : vector<16x1xf32>
    %12 = vector.broadcast %11 : vector<16x1xf32> to vector<16x32xf32>
    %13 = arith.subf %7, %12 : vector<16x32xf32>
    %14 = arith.mulf %13, %13 : vector<16x32xf32>
    %cst_9 = arith.constant dense<0.000000e+00> : vector<16xf32>
    %15 = vector.multi_reduction <add>, %14, %cst_9 [1] : vector<16x32xf32> to vector<16xf32>
    %16 = vector.shape_cast %15 : vector<16xf32> to vector<16x1xf32>
    %cst_10 = arith.constant 3.125000e-02 : f32
    %17 = vector.broadcast %cst_10 : f32 to vector<16x1xf32>
    %18 = arith.mulf %16, %17 : vector<16x1xf32>
    %cst_11 = arith.constant 9.99999974E-6 : f32
    %19 = vector.broadcast %cst_11 : f32 to vector<16x1xf32>
    %20 = arith.addf %18, %19 : vector<16x1xf32>
    %21 = math.rsqrt %20 : vector<16x1xf32>
    %22 = vector.broadcast %21 : vector<16x1xf32> to vector<16x32xf32>
    %23 = arith.mulf %13, %22 : vector<16x32xf32>
    %c0_12 = arith.constant 0 : index
    %c0_13 = arith.constant 0 : index
    %24 = vector.load %arg5[%c0_12, %c0_13] : memref<1x32xf32, #tpu.memory_space<vmem>>, vector<1x32xf32>
    %25 = vector.broadcast %24 : vector<1x32xf32> to vector<16x32xf32>
    %26 = arith.mulf %23, %25 : vector<16x32xf32>
    %c0_14 = arith.constant 0 : index
    %c0_15 = arith.constant 0 : index
    %27 = vector.load %arg6[%c0_14, %c0_15] : memref<1x32xf32, #tpu.memory_space<vmem>>, vector<1x32xf32>
    %28 = vector.broadcast %27 : vector<1x32xf32> to vector<16x32xf32>
    %29 = arith.addf %26, %28 : vector<16x32xf32>
    %c0_16 = arith.constant 0 : index
    %c0_17 = arith.constant 0 : index
    %30 = vector.load %arg7[%c0_16, %c0_17] : memref<16x32xf32, #tpu.memory_space<vmem>>, vector<16x32xf32>
    tpu.vector_store %arg7[%c0_16, %c0_17], %29 {strides = array<i32>} : memref<16x32xf32, #tpu.memory_space<vmem>>, vector<16x32xf32>,
    return
  }
  func.func @transform_0(%arg0: i32) -> (i32, i32) {
    %c0_i32 = arith.constant 0 : i32
    %c0_i32_0 = arith.constant 0 : i32
    return %arg0, %c0_i32 : i32, i32
  }
  func.func @transform_1(%arg0: i32) -> (i32, i32) {
    %c0_i32 = arith.constant 0 : i32
    %c0_i32_0 = arith.constant 0 : i32
    %c0_i32_1 = arith.constant 0 : i32
    return %c0_i32, %c0_i32_0 : i32, i32
  }
  func.func @transform_2(%arg0: i32) -> (i32, i32) {
    %c0_i32 = arith.constant 0 : i32
    %c0_i32_0 = arith.constant 0 : i32
    %c0_i32_1 = arith.constant 0 : i32
    return %c0_i32, %c0_i32_0 : i32, i32
  }
  func.func @transform_3(%arg0: i32) -> (i32, i32) {
    %c0_i32 = arith.constant 0 : i32
    %c0_i32_0 = arith.constant 0 : i32
    return %arg0, %c0_i32 : i32, i32
  }
  func.func @transform_4(%arg0: i32) -> (i32, i32) {
    %c0_i32 = arith.constant 0 : i32
    %c0_i32_0 = arith.constant 0 : i32
    %c0_i32_1 = arith.constant 0 : i32
    return %c0_i32, %c0_i32_0 : i32, i32
  }
  func.func @transform_5(%arg0: i32) -> (i32, i32) {
    %c0_i32 = arith.constant 0 : i32
    %c0_i32_0 = arith.constant 0 : i32
    %c0_i32_1 = arith.constant 0 : i32
    return %c0_i32, %c0_i32_0 : i32, i32
  }
  func.func @transform_6(%arg0: i32) -> (i32, i32) {
    %c0_i32 = arith.constant 0 : i32
    %c0_i32_0 = arith.constant 0 : i32
    return %arg0, %c0_i32 : i32, i32
  }
}

</mosaic_0001>

<bundles_post_ra>
// kernel: tpu_custom_call.1
= control target key start
LH: loop header
LB: loop body
LE: loop exit
PB: predicated region body
PF: predicated region fallthrough
CT: control target
= control target key end

     0   :  { %s392_s0 = inlined_call_operand.vmem [shape: f32[16,128], index: 0, kind: input, shape index: {}]   ;;  %s393_s1 = inlined_call_operand.vmem [shape: f32[128,32], index: 1, kind: input, shape index: {}]   ;;  %s394_s2 = inlined_call_operand.vmem [shape: f32[1,32], index: 2, kind: input, shape index: {}]   ;;  %s395_s3 = inlined_call_operand.vmem [shape: f32[16,32], index: 3, kind: input, shape index: {}]   ;;  %s396_s4 = inlined_call_operand.vmem [shape: f32[1,32], index: 4, kind: input, shape index: {}]   ;;  %s397_s5 = inlined_call_operand.vmem [shape: f32[1,32], index: 5, kind: input, shape index: {}]   ;;  %s398_s6 = inlined_call_operand.hbm [shape: f32[16,32], index: 6, kind: output, shape index: {}]  }
   0x1   :  { %v41_v0 = vld [vmem:[%s393_s1 + $0x78] sm:$0xff]  ;;  %v40_v1 = vld [vmem:[%s393_s1 + $0x70] sm:$0xff]  ;;  %v39_v2 = vld [vmem:[%s393_s1 + $0x68] sm:$0xff] }
   0x2   :  { %212 = vmatprep.subr.mxu0 %v41_v0  ;;  %v38_v3 = vld [vmem:[%s393_s1 + $0x60] sm:$0xff]  ;;  %v37_v5 = vld [vmem:[%s393_s1 + $0x58] sm:$0xff] }
   0x3   :  { %213 = vmatpush3.msra.mxu0 %v41_v0  ;;  %v24_v4 = vld [vmem:[%s392_s0] sm:$0xff] }
   0x4   :  { %214 = vmatprep.subr.mxu0 %v40_v1  ;;  %244 = vmatprep.mubr.f32.mxu0 %v24_v4 }
   0x5   :  { %215 = vmatpush3.msra.mxu0 %v40_v1 }
   0x6   :  { %216 = vmatprep.subr.mxu0 %v39_v2 }
   0x7   :  { %217 = vmatpush3.msra.mxu0 %v39_v2 }
   0x8   :  { %11 = vsyncpa [#allocation3], 0  ;;  %218 = vmatprep.subr.mxu0 %v38_v3  ;;  %v36_v6 = vld [vmem:[%s393_s1 + $0x50] sm:$0xff]  ;;  %v35_v7 = vld [vmem:[%s393_s1 + $0x48] sm:$0xff]  ;;  %vm128_vm0 = vcmask 261120   ;;  %s276_s15 = smov [#allocation2]  }
   0x9   :  { %219 = vmatpush3.msra.mxu0 %v38_v3  ;;  %v34_v8 = vld [vmem:[%s393_s1 + $0x40] sm:$0xff]  ;;  %v33_v9 = vld [vmem:[%s393_s1 + $0x38] sm:$0xff]  ;;  %v32_v10 = vld [vmem:[%s393_s1 + $0x30] sm:$0xff]  ;;  %s180_s16 = sshll.u32 %s276_s15, 4  ;;  %s181_s16 = int_to_ptr.vmem [resolvable:$true] %s180_s16 }
   0xa   :  { %220 = vmatprep.subr.mxu0 %v37_v5  ;;  %v31_v11 = vld [vmem:[%s393_s1 + $0x28] sm:$0xff]  ;;  %v30_v12 = vld [vmem:[%s393_s1 + $0x20] sm:$0xff]  ;;  %v29_v13 = vld [vmem:[%s393_s1 + $0x18] sm:$0xff]  ;;  %s254_s17 = scalar_lea.vmem %s181_s16, 256  ;;  %p259_p1 = scmp.lt.s32.totalorder %s181_s16, %s181_s16 }
   0xb   :  { %221 = vmatpush3.msra.mxu0 %v37_v5  ;;  %v28_v14 = vld [vmem:[%s393_s1 + $0x10] sm:$0xff]  ;;  %v27_v15 = vld [vmem:[%s393_s1 + $0x8] sm:$0xff]  ;;  %v26_v16 = vld [vmem:[%s393_s1] sm:$0xff]  ;;  %p255_p0 = scmp.ne.s32.totalorder %s181_s16, %s254_s17  ;;  %p260_p2 = scmp.lt.s32.totalorder %s254_s17, %s254_s17 }
   0xc   :  { %222 = vmatprep.subr.mxu0 %v36_v6  ;;  %v25_v17 = vld [vmem:[%s392_s0 + $0x8] sm:$0xff]  ;;  %v191_v19 = vld [vmem:[%s394_s2] ss:$0 sm:$0xff] }
   0xd   :  { %223 = vmatpush3.msra.mxu0 %v36_v6  ;;  %v124_v21 = vld [vmem:[%s395_s3] sm:$0xff]  ;;  %v125_v24 = vld [vmem:[%s395_s3 + $0x8] sm:$0xff]  ;;  %p261_p3 = por %p260_p2, %p259_p1 }
   0xe   :  { %224 = vmatprep.subr.mxu0 %v35_v7  ;;  %v192_v46 = vld [vmem:[%s396_s4] ss:$0 sm:$0xff] }
   0xf   :  { %225 = vmatpush3.msra.mxu0 %v35_v7  ;;  %v193_v48 = vld [vmem:[%s397_s5] ss:$0 sm:$0xff]  ;;  %p262_p4 = pnand %p261_p3, %p255_p0 }
  0x10   :  { %226 = vmatprep.subr.mxu0 %v34_v8 }
  0x11   :  { %227 = vmatpush3.msra.mxu0 %v34_v8 }
  0x12   :  { %228 = vmatprep.subr.mxu0 %v33_v9 }
  0x13   :  { %229 = vmatpush3.msra.mxu0 %v33_v9 }
  0x14   :  { %230 = vmatprep.subr.mxu0 %v32_v10 }
  0x15   :  { %231 = vmatpush3.msra.mxu0 %v32_v10 }
  0x16   :  { %232 = vmatprep.subr.mxu0 %v31_v11 }
  0x17   :  { %233 = vmatpush3.msra.mxu0 %v31_v11 }
  0x18   :  { %234 = vmatprep.subr.mxu0 %v30_v12 }
  0x19   :  { %235 = vmatpush3.msra.mxu0 %v30_v12 }
  0x1a   :  { %236 = vmatprep.subr.mxu0 %v29_v13 }
  0x1b   :  { %237 = vmatpush3.msra.mxu0 %v29_v13 }
  0x1c   :  { %238 = vmatprep.subr.mxu0 %v28_v14 }
  0x1d   :  { %239 = vmatpush3.msra.mxu0 %v28_v14 }
  0x1e   :  { %240 = vmatprep.subr.mxu0 %v27_v15 }
  0x1f   :  { %241 = vmatpush3.msra.mxu0 %v27_v15 }
  0x20   :  { %242 = vmatprep.subr.mxu0 %v26_v16 }
  0x21   :  { %243 = vmatpush3.msra.mxu0 %v26_v16 }
  0x22   :  { %245 = vmatmul.mubr.f32.vlgmr.msra.gmra.mxu0 %v25_v17 }
  0xe2   :  { %v246_v18 = vpop.f32.mrf.mxu0 }
  0xe3   :  { %v121_v22 = vadd.f32 %v246_v18, %v191_v19 }
  0xe4   :  { %v115_v20 = vpop.f32.mrf.mxu0 }
  0xe5   :  { %v116_v23 = vadd.f32 %v191_v19, %v115_v20  ;;  %v127_v27 = vadd.f32 %v125_v24, %v121_v22 }
  0xe7   :  { %v126_v25 = vadd.f32 %v124_v21, %v116_v23  ;;  %v132_v28 = vsel %vm128_vm0, %v127_v27, 0.0 }
  0xe9   :  { %v129_v26 = vsel %vm128_vm0, %v126_v25, 0.0 }
  0xea   :  { %130 = vadd.xlane.f32.xlu0 %v129_v26 }
  0xee   :  { %133 = vadd.xlane.f32.xlu0 %v132_v28 }
 0x173   :  { %v131_v29 = vpop.xlane.xlu0 %130 }
 0x174   :  { %v135_v30 = vmul.f32 0.03125, %v131_v29 }
 0x176   :  { %v137_v31 = vsub.f32 %v126_v25, %v135_v30 }
 0x177   :  { %v134_v32 = vpop.xlane.xlu0 %133 }
 0x178   :  { %v136_v33 = vmul.f32 0.03125, %v134_v32  ;;  %v139_v34 = vmul.f32 %v137_v31, %v137_v31 }
 0x17a   :  { %v138_v35 = vsub.f32 %v127_v27, %v136_v33  ;;  %v141_v36 = vsel %vm128_vm0, %v139_v34, 0.0 }
 0x17b   :  { %142 = vadd.xlane.f32.xlu1 %v141_v36 }
 0x17c   :  { %v140_v37 = vmul.f32 %v138_v35, %v138_v35 }
 0x17e   :  { %v144_v38 = vsel %vm128_vm0, %v140_v37, 0.0 }
 0x17f   :  { %145 = vadd.xlane.f32.xlu1 %v144_v38 }
 0x204   :  { %v143_v39 = vpop.xlane.xlu1 %142 }
 0x205   :  { %v147_v40 = vmul.f32 0.03125, %v143_v39 }
 0x207   :  { %v149_v41 = vadd.f32 1e-05, %v147_v40 }
 0x208   :  { %v146_v42 = vpop.xlane.xlu1 %145 }
 0x209   :  { %250 = vrsqrt.f32 %v149_v41  ;;  %v148_v43 = vmul.f32 0.03125, %v146_v42 }
 0x20b   :  { %v150_v44 = vadd.f32 1e-05, %v148_v43 }
 0x20d   :  { %252 = vrsqrt.f32 %v150_v44 }
 0x216   :  { %v251_v45 = vpop.eup %250 }
 0x217   :  { %v153_v47 = vmul.f32 %v251_v45, %v137_v31 }
 0x219   :  { %v162_v49 = vmul.f32 %v192_v46, %v153_v47 }
 0x21a   :  { %v253_v50 = vpop.eup %252 }
 0x21b   :  { %v154_v51 = vmul.f32 %v253_v50, %v138_v35  ;;  %v171_v52 = vadd.f32 %v193_v48, %v162_v49 }
 0x21d   :  { %v163_v53 = vmul.f32 %v192_v46, %v154_v51  ;;  %173 = vst.msk [vmem:[#allocation2] sm:$0xff] %vm128_vm0, %v171_v52 }
 0x21f   :  { %v172_v54 = vadd.f32 %v193_v48, %v163_v53 }
 0x221   :  { %174 = vst.msk [vmem:[#allocation2 + $0x8] sm:$0xff] %vm128_vm0, %v172_v54 }
 0x222   :  { %265 = shalt.err (!%p262_p4)
}
 0x223   :  { %s277_s4 = smov 128   ;;  %s278_s5 = smov 8  }
 0x224   :  { %186 = dma.vmem_to_hbm [thread:$0]  %s181_s16, 256, %s398_s6, [#allocation3], %s277_s4, %s277_s4, %s278_s5  }
 0x225   :  { %274 = dma.done.wait [#allocation3], 256  }
 0x226   :  { %275 = vsyncadd [#allocation3], 4294967040 }
 0x227   :  { %190 = vsyncpa [#allocation3], 1 }

// kernel: tpu_custom_call.1
= control target key start
LH: loop header
LB: loop body
LE: loop exit
PB: predicated region body
PF: predicated region fallthrough
CT: control target
= control target key end

     0   :  { %s392_s0 = inlined_call_operand.vmem [shape: f32[16,128], index: 0, kind: input, shape index: {}]   ;;  %s393_s1 = inlined_call_operand.vmem [shape: f32[128,32], index: 1, kind: input, shape index: {}]   ;;  %s394_s2 = inlined_call_operand.vmem [shape: f32[1,32], index: 2, kind: input, shape index: {}]   ;;  %s395_s3 = inlined_call_operand.vmem [shape: f32[16,32], index: 3, kind: input, shape index: {}]   ;;  %s396_s4 = inlined_call_operand.vmem [shape: f32[1,32], index: 4, kind: input, shape index: {}]   ;;  %s397_s5 = inlined_call_operand.vmem [shape: f32[1,32], index: 5, kind: input, shape index: {}]   ;;  %s398_s6 = inlined_call_operand.hbm [shape: f32[16,32], index: 6, kind: output, shape index: {}]  }
   0x1   :  { %v41_v0 = vld [vmem:[%s393_s1 + $0x78] sm:$0xff]  ;;  %v40_v1 = vld [vmem:[%s393_s1 + $0x70] sm:$0xff]  ;;  %v39_v2 = vld [vmem:[%s393_s1 + $0x68] sm:$0xff] }
   0x2   :  { %212 = vmatprep.subr.mxu0 %v41_v0  ;;  %v38_v3 = vld [vmem:[%s393_s1 + $0x60] sm:$0xff]  ;;  %v37_v5 = vld [vmem:[%s393_s1 + $0x58] sm:$0xff] }
   0x3   :  { %213 = vmatpush3.msra.mxu0 %v41_v0  ;;  %v24_v4 = vld [vmem:[%s392_s0] sm:$0xff] }
   0x4   :  { %214 = vmatprep.subr.mxu0 %v40_v1  ;;  %244 = vmatprep.mubr.f32.mxu0 %v24_v4 }
   0x5   :  { %215 = vmatpush3.msra.mxu0 %v40_v1 }
   0x6   :  { %216 = vmatprep.subr.mxu0 %v39_v2 }
   0x7   :  { %217 = vmatpush3.msra.mxu0 %v39_v2 }
   0x8   :  { %11 = vsyncpa [#allocation3], 0  ;;  %218 = vmatprep.subr.mxu0 %v38_v3  ;;  %v36_v6 = vld [vmem:[%s393_s1 + $0x50] sm:$0xff]  ;;  %v35_v7 = vld [vmem:[%s393_s1 + $0x48] sm:$0xff]  ;;  %vm128_vm0 = vcmask 261120   ;;  %s276_s15 = smov [#allocation2]  }
   0x9   :  { %219 = vmatpush3.msra.mxu0 %v38_v3  ;;  %v34_v8 = vld [vmem:[%s393_s1 + $0x40] sm:$0xff]  ;;  %v33_v9 = vld [vmem:[%s393_s1 + $0x38] sm:$0xff]  ;;  %v32_v10 = vld [vmem:[%s393_s1 + $0x30] sm:$0xff]  ;;  %s180_s16 = sshll.u32 %s276_s15, 4  ;;  %s181_s16 = int_to_ptr.vmem [resolvable:$true] %s180_s16 }
   0xa   :  { %220 = vmatprep.subr.mxu0 %v37_v5  ;;  %v31_v11 = vld [vmem:[%s393_s1 + $0x28] sm:$0xff]  ;;  %v30_v12 = vld [vmem:[%s393_s1 + $0x20] sm:$0xff]  ;;  %v29_v13 = vld [vmem:[%s393_s1 + $0x18] sm:$0xff]  ;;  %s254_s17 = scalar_lea.vmem %s181_s16, 256  ;;  %p259_p1 = scmp.lt.s32.totalorder %s181_s16, %s181_s16 }
   0xb   :  { %221 = vmatpush3.msra.mxu0 %v37_v5  ;;  %v28_v14 = vld [vmem:[%s393_s1 + $0x10] sm:$0xff]  ;;  %v27_v15 = vld [vmem:[%s393_s1 + $0x8] sm:$0xff]  ;;  %v26_v16 = vld [vmem:[%s393_s1] sm:$0xff]  ;;  %p255_p0 = scmp.ne.s32.totalorder %s181_s16, %s254_s17  ;;  %p260_p2 = scmp.lt.s32.totalorder %s254_s17, %s254_s17 }
   0xc   :  { %222 = vmatprep.subr.mxu0 %v36_v6  ;;  %v25_v17 = vld [vmem:[%s392_s0 + $0x8] sm:$0xff]  ;;  %v191_v19 = vld [vmem:[%s394_s2] ss:$0 sm:$0xff] }
   0xd   :  { %223 = vmatpush3.msra.mxu0 %v36_v6  ;;  %v124_v21 = vld [vmem:[%s395_s3] sm:$0xff]  ;;  %v125_v24 = vld [vmem:[%s395_s3 + $0x8] sm:$0xff]  ;;  %p261_p3 = por %p260_p2, %p259_p1 }
   0xe   :  { %224 = vmatprep.subr.mxu0 %v35_v7  ;;  %v192_v46 = vld [vmem:[%s396_s4] ss:$0 sm:$0xff] }
   0xf   :  { %225 = vmatpush3.msra.mxu0 %v35_v7  ;;  %v193_v48 = vld [vmem:[%s397_s5] ss:$0 sm:$0xff]  ;;  %p262_p4 = pnand %p261_p3, %p255_p0 }
  0x10   :  { %226 = vmatprep.subr.mxu0 %v34_v8 }
  0x11   :  { %227 = vmatpush3.msra.mxu0 %v34_v8 }
  0x12   :  { %228 = vmatprep.subr.mxu0 %v33_v9 }
  0x13   :  { %229 = vmatpush3.msra.mxu0 %v33_v9 }
  0x14   :  { %230 = vmatprep.subr.mxu0 %v32_v10 }
  0x15   :  { %231 = vmatpush3.msra.mxu0 %v32_v10 }
  0x16   :  { %232 = vmatprep.subr.mxu0 %v31_v11 }
  0x17   :  { %233 = vmatpush3.msra.mxu0 %v31_v11 }
  0x18   :  { %234 = vmatprep.subr.mxu0 %v30_v12 }
  0x19   :  { %235 = vmatpush3.msra.mxu0 %v30_v12 }
  0x1a   :  { %236 = vmatprep.subr.mxu0 %v29_v13 }
  0x1b   :  { %237 = vmatpush3.msra.mxu0 %v29_v13 }
  0x1c   :  { %238 = vmatprep.subr.mxu0 %v28_v14 }
  0x1d   :  { %239 = vmatpush3.msra.mxu0 %v28_v14 }
  0x1e   :  { %240 = vmatprep.subr.mxu0 %v27_v15 }
  0x1f   :  { %241 = vmatpush3.msra.mxu0 %v27_v15 }
  0x20   :  { %242 = vmatprep.subr.mxu0 %v26_v16 }
  0x21   :  { %243 = vmatpush3.msra.mxu0 %v26_v16 }
  0x22   :  { %245 = vmatmul.mubr.f32.vlgmr.msra.gmra.mxu0 %v25_v17 }
  0xe2   :  { %v246_v18 = vpop.f32.mrf.mxu0 }
  0xe3   :  { %v121_v22 = vadd.f32 %v246_v18, %v191_v19 }
  0xe4   :  { %v115_v20 = vpop.f32.mrf.mxu0 }
  0xe5   :  { %v116_v23 = vadd.f32 %v191_v19, %v115_v20  ;;  %v127_v27 = vadd.f32 %v125_v24, %v121_v22 }
  0xe7   :  { %v126_v25 = vadd.f32 %v124_v21, %v116_v23  ;;  %v132_v28 = vsel %vm128_vm0, %v127_v27, 0.0 }
  0xe9   :  { %v129_v26 = vsel %vm128_vm0, %v126_v25, 0.0 }
  0xea   :  { %130 = vadd.xlane.f32.xlu0 %v129_v26 }
  0xee   :  { %133 = vadd.xlane.f32.xlu0 %v132_v28 }
 0x173   :  { %v131_v29 = vpop.xlane.xlu0 %130 }
 0x174   :  { %v135_v30 = vmul.f32 0.03125, %v131_v29 }
 0x176   :  { %v137_v31 = vsub.f32 %v126_v25, %v135_v30 }
 0x177   :  { %v134_v32 = vpop.xlane.xlu0 %133 }
 0x178   :  { %v136_v33 = vmul.f32 0.03125, %v134_v32  ;;  %v139_v34 = vmul.f32 %v137_v31, %v137_v31 }
 0x17a   :  { %v138_v35 = vsub.f32 %v127_v27, %v136_v33  ;;  %v141_v36 = vsel %vm128_vm0, %v139_v34, 0.0 }
 0x17b   :  { %142 = vadd.xlane.f32.xlu1 %v141_v36 }
 0x17c   :  { %v140_v37 = vmul.f32 %v138_v35, %v138_v35 }
 0x17e   :  { %v144_v38 = vsel %vm128_vm0, %v140_v37, 0.0 }
 0x17f   :  { %145 = vadd.xlane.f32.xlu1 %v144_v38 }
 0x204   :  { %v143_v39 = vpop.xlane.xlu1 %142 }
 0x205   :  { %v147_v40 = vmul.f32 0.03125, %v143_v39 }
 0x207   :  { %v149_v41 = vadd.f32 1e-05, %v147_v40 }
 0x208   :  { %v146_v42 = vpop.xlane.xlu1 %145 }
 0x209   :  { %250 = vrsqrt.f32 %v149_v41  ;;  %v148_v43 = vmul.f32 0.03125, %v146_v42 }
 0x20b   :  { %v150_v44 = vadd.f32 1e-05, %v148_v43 }
 0x20d   :  { %252 = vrsqrt.f32 %v150_v44 }
 0x216   :  { %v251_v45 = vpop.eup %250 }
 0x217   :  { %v153_v47 = vmul.f32 %v251_v45, %v137_v31 }
 0x219   :  { %v162_v49 = vmul.f32 %v192_v46, %v153_v47 }
 0x21a   :  { %v253_v50 = vpop.eup %252 }
 0x21b   :  { %v154_v51 = vmul.f32 %v253_v50, %v138_v35  ;;  %v171_v52 = vadd.f32 %v193_v48, %v162_v49 }
 0x21d   :  { %v163_v53 = vmul.f32 %v192_v46, %v154_v51  ;;  %173 = vst.msk [vmem:[#allocation2] sm:$0xff] %vm128_vm0, %v171_v52 }
 0x21f   :  { %v172_v54 = vadd.f32 %v193_v48, %v163_v53 }
 0x221   :  { %174 = vst.msk [vmem:[#allocation2 + $0x8] sm:$0xff] %vm128_vm0, %v172_v54 }
 0x222   :  { %265 = shalt.err (!%p262_p4)
}
 0x223   :  { %s277_s4 = smov 128   ;;  %s278_s5 = smov 8  }
 0x224   :  { %186 = dma.vmem_to_hbm [thread:$0]  %s181_s16, 256, %s398_s6, [#allocation3], %s277_s4, %s277_s4, %s278_s5  }
 0x225   :  { %274 = dma.done.wait [#allocation3], 256  }
 0x226   :  { %275 = vsyncadd [#allocation3], 4294967040 }
 0x227   :  { %190 = vsyncpa [#allocation3], 1 }

</bundles_post_ra>
